<compile_context>
chip_gen: v6e
topology: v6e:2x2x1
jax: 0.10.0
libtpu: 0.0.40
codegen_flags: <defaults>
</compile_context>

<pallas_src>
import functools

import jax
import jax.numpy as jnp
from jax.experimental import pallas as pl
from jax.experimental.pallas import tpu as pltpu


H1_PAD = 128  # fc1 hidden width (64) zero-padded to a lane-dense 128


def decoder_kernel(z_ref, w1_ref, b1_ref, w2_ref, b2_ref, w3_ref, b3_ref, out_ref):
    """Fused fc1 -> ReLU -> fc2 -> ReLU -> fc3 -> sigmoid on one batch tile."""
    z = z_ref[...].astype(jnp.bfloat16)  # in-kernel cast (VPU), input stays f32 in HBM
    h1 = jnp.dot(z, w1_ref[...], preferred_element_type=jnp.float32) + b1_ref[...]
    h1 = jnp.maximum(h1, 0.0)                                       # ReLU (f32)
    h2 = jnp.dot(h1.astype(jnp.bfloat16), w2_ref[...],
                 preferred_element_type=jnp.float32) + b2_ref[...]
    h2 = jnp.maximum(h2, 0.0)                                       # ReLU (f32)
    logits = jnp.dot(h2.astype(jnp.bfloat16), w3_ref[...],
                     preferred_element_type=jnp.float32) + b3_ref[...]
    # sigmoid = 1 / (1 + exp(-x)): exp on EUP, approx reciprocal also on EUP,
    # leaving VALU slots free for the bias/ReLU/cast work.
    out_ref[...] = pl.reciprocal(1.0 + jnp.exp(-logits), approx=True)


def prepack_decoder_params(w1, b1, w2, b2, w3, b3):
    """One-time pre-pack: pad hidden/output dims to lane-dense widths, cast
    weights to bf16 (MXU operands). Biases stay f32. Padding is exact:
    ReLU(0 + 0) = 0 in the padded hidden columns and the matching zero rows of
    w2 contribute nothing; padded output columns are sliced off in the wrapper."""
    latent_dim, h1 = w1.shape          # (latent, 64)
    h2 = w2.shape[1]                   # 128
    out_dim = w3.shape[1]
    out_pad = ((out_dim + 127) // 128) * 128

    w1p = jnp.zeros((latent_dim, H1_PAD), jnp.float32).at[:, :h1].set(w1)
    b1p = jnp.zeros((1, H1_PAD), jnp.float32).at[:, :h1].set(b1)
    w2p = jnp.zeros((H1_PAD, h2), jnp.float32).at[:h1, :].set(w2)
    w3p = jnp.zeros((h2, out_pad), jnp.float32).at[:, :out_dim].set(w3)
    b3p = jnp.zeros((1, out_pad), jnp.float32).at[:, :out_dim].set(b3)

    packed = (w1p.astype(jnp.bfloat16), b1p,
              w2p.astype(jnp.bfloat16), b2.astype(jnp.float32),
              w3p.astype(jnp.bfloat16), b3p)
    return packed, out_dim


def _pick_batch_tile(B, max_tile=1024):
    # Single big block for B <= max_tile (no per-step overhead; weights loaded
    # exactly once). Beyond that, fixed roofline-sized tiles (8-aligned) with a
    # cdiv grid -- yields >= 2 "parallel" steps so v7x's two TCs share the work.
    if B <= max_tile:
        return B
    return max(8, (max_tile // 8) * 8)


@functools.partial(jax.jit, static_argnames=("out_dim", "max_batch_tile"))
def decoder_forward(z, w1, b1, w2, b2, w3, b3, *, out_dim, max_batch_tile=1024):
    """z: (B, latent) f32. Weights pre-packed (bf16, padded). Returns f32 (B, out_dim)."""
    B, latent_dim = z.shape
    out_pad = w3.shape[1]

    tile = _pick_batch_tile(B, max_batch_tile)
    n_steps = pl.cdiv(B, tile)
    B_pad = n_steps * tile
    zp = z if B_pad == B else jnp.pad(z, ((0, B_pad - B), (0, 0)))

    # Constant index_map -> weight/bias blocks are fetched once and stay
    # VMEM-resident across grid steps (~200 KB total, far under any gen's VMEM).
    def const(shape):
        return pl.BlockSpec(shape, lambda i: (0, 0))

    out = pl.pallas_call(
        decoder_kernel,
        out_shape=jax.ShapeDtypeStruct((B_pad, out_pad), jnp.float32),
        grid=(n_steps,),
        in_specs=[
            pl.BlockSpec((tile, latent_dim), lambda i: (i, 0)),  # z tile (f32)
            const(w1.shape), const(b1.shape),
            const(w2.shape), const(b2.shape),
            const(w3.shape), const(b3.shape),
        ],
        out_specs=pl.BlockSpec((tile, out_pad), lambda i: (i, 0)),
        compiler_params=pltpu.CompilerParams(
            dimension_semantics=("parallel",)),
    )(zp, w1, b1, w2, b2, w3, b3)

    if B_pad != B or out_pad != out_dim:
        out = out[:B, :out_dim]
    return out


def init_params(key, latent_dim, output_dim):
    # Deterministic init mimicking torch.nn.Linear default (uniform +-1/sqrt(fan_in)).
    dims = [(latent_dim, 64), (64, 128), (128, output_dim)]
    params = []
    for fan_in, fan_out in dims:
        key, kw, kb = jax.random.split(key, 3)
        bound = 1.0 / jnp.sqrt(fan_in)
        w = jax.random.uniform(kw, (fan_in, fan_out), jnp.float32, -bound, bound)
        b = jax.random.uniform(kb, (1, fan_out), jnp.float32, -bound, bound)
        params += [w, b]
    return params


if __name__ == "__main__":
    latent_dim = 32
    output_dim = 256
    batch = 16

    key = jax.random.PRNGKey(0)
    key, kz = jax.random.split(key)
    z = jax.random.normal(kz, (batch, latent_dim), jnp.float32)

    w1, b1, w2, b2, w3, b3 = init_params(key, latent_dim, output_dim)

    # One-time pre-pack (pad + bf16 cast) -- hoisted out of the forward path.
    packed, out_dim = prepack_decoder_params(w1, b1, w2, b2, w3, b3)
    packed = jax.block_until_ready(jax.device_put(packed))

    out = decoder_forward(z, *packed, out_dim=out_dim)
    out = jax.block_until_ready(out)

    # Pure-JAX f32 reference with the original (unpadded) weights.
    h = jnp.maximum(z @ w1 + b1, 0.0)
    h = jnp.maximum(h @ w2 + b2, 0.0)
    ref = jax.nn.sigmoid(h @ w3 + b3)

    assert out.shape == (batch, output_dim)
    # bf16 MXU operands (f32 accumulation) + approx reciprocal -> loose tolerance.
    max_err = float(jnp.max(jnp.abs(out - ref)))
    assert jnp.allclose(out, ref, atol=2e-2, rtol=0.0), f"max abs err {max_err}"

    print("KERNEL_OK")
</pallas_src>

<mosaic_0001>
module attributes {stable_mosaic.version = 11 : i64} {
  func.func @decoder_kernel(%arg0: i32, %arg1: memref<16x32xf32, #tpu.memory_space<vmem>>, %arg2: memref<32x128xbf16, #tpu.memory_space<vmem>>, %arg3: memref<1x128xf32, #tpu.memory_space<vmem>>, %arg4: memref<128x128xbf16, #tpu.memory_space<vmem>>, %arg5: memref<1x128xf32, #tpu.memory_space<vmem>>, %arg6: memref<128x256xbf16, #tpu.memory_space<vmem>>, %arg7: memref<1x256xf32, #tpu.memory_space<vmem>>, %arg8: memref<16x256xf32, #tpu.memory_space<vmem>>) attributes {dimension_semantics = [#tpu.dimension_semantics<parallel>], iteration_bounds = array<i64: 1>, scalar_prefetch = 0 : i64, scratch_operands = 0 : i64, tpu.core_type = #tpu.core_type<tc>, window_params = [{transform_indices = @transform_0, window_bounds = array<i64: 16, 32>}, {pipeline_mode = #tpu.pipeline_mode<synchronous>, transform_indices = @transform_1, window_bounds = array<i64: 32, 128>}, {pipeline_mode = #tpu.pipeline_mode<synchronous>, transform_indices = @transform_2, window_bounds = array<i64: 1, 128>}, {pipeline_mode = #tpu.pipeline_mode<synchronous>, transform_indices = @transform_3, window_bounds = array<i64: 128, 128>}, {pipeline_mode = #tpu.pipeline_mode<synchronous>, transform_indices = @transform_4, window_bounds = array<i64: 1, 128>}, {pipeline_mode = #tpu.pipeline_mode<synchronous>, transform_indices = @transform_5, window_bounds = array<i64: 128, 256>}, {pipeline_mode = #tpu.pipeline_mode<synchronous>, transform_indices = @transform_6, window_bounds = array<i64: 1, 256>}, {transform_indices = @transform_7, window_bounds = array<i64: 16, 256>}]} {
    %c0 = arith.constant 0 : index
    %c0_0 = arith.constant 0 : index
    %0 = vector.load %arg1[%c0, %c0_0] : memref<16x32xf32, #tpu.memory_space<vmem>>, vector<16x32xf32>
    %1 = arith.truncf %0 : vector<16x32xf32> to vector<16x32xbf16>
    %c0_1 = arith.constant 0 : index
    %c0_2 = arith.constant 0 : index
    %2 = vector.load %arg2[%c0_1, %c0_2] : memref<32x128xbf16, #tpu.memory_space<vmem>>, vector<32x128xbf16>
    %cst = arith.constant dense<0.000000e+00> : vector<16x128xf32>
    %3 = tpu.matmul %1, %2, %cst {dimension_numbers = #tpu.dot_dimension_numbers<[1], [0], [0], [1], [0, 0, 1, 1], [], []>} : vector<16x32xbf16>, vector<32x128xbf16>, vector<16x128xf32> -> vector<16x128xf32>
    %c0_3 = arith.constant 0 : index
    %c0_4 = arith.constant 0 : index
    %4 = vector.load %arg3[%c0_3, %c0_4] : memref<1x128xf32, #tpu.memory_space<vmem>>, vector<1x128xf32>
    %5 = vector.broadcast %4 : vector<1x128xf32> to vector<16x128xf32>
    %6 = arith.addf %3, %5 : vector<16x128xf32>
    %cst_5 = arith.constant 0.000000e+00 : f32
    %7 = vector.broadcast %cst_5 : f32 to vector<16x128xf32>
    %8 = arith.maximumf %6, %7 : vector<16x128xf32>
    %9 = arith.truncf %8 : vector<16x128xf32> to vector<16x128xbf16>
    %c0_6 = arith.constant 0 : index
    %c0_7 = arith.constant 0 : index
    %10 = vector.load %arg4[%c0_6, %c0_7] : memref<128x128xbf16, #tpu.memory_space<vmem>>, vector<128x128xbf16>
    %cst_8 = arith.constant dense<0.000000e+00> : vector<16x128xf32>
    %11 = tpu.matmul %9, %10, %cst_8 {dimension_numbers = #tpu.dot_dimension_numbers<[1], [0], [0], [1], [0, 0, 1, 1], [], []>} : vector<16x128xbf16>, vector<128x128xbf16>, vector<16x128xf32> -> vector<16x128xf32>
    %c0_9 = arith.constant 0 : index
    %c0_10 = arith.constant 0 : index
    %12 = vector.load %arg5[%c0_9, %c0_10] : memref<1x128xf32, #tpu.memory_space<vmem>>, vector<1x128xf32>
    %13 = vector.broadcast %12 : vector<1x128xf32> to vector<16x128xf32>
    %14 = arith.addf %11, %13 : vector<16x128xf32>
    %cst_11 = arith.constant 0.000000e+00 : f32
    %15 = vector.broadcast %cst_11 : f32 to vector<16x128xf32>
    %16 = arith.maximumf %14, %15 : vector<16x128xf32>
    %17 = arith.truncf %16 : vector<16x128xf32> to vector<16x128xbf16>
    %c0_12 = arith.constant 0 : index
    %c0_13 = arith.constant 0 : index
    %18 = vector.load %arg6[%c0_12, %c0_13] : memref<128x256xbf16, #tpu.memory_space<vmem>>, vector<128x256xbf16>
    %cst_14 = arith.constant dense<0.000000e+00> : vector<16x256xf32>
    %19 = tpu.matmul %17, %18, %cst_14 {dimension_numbers = #tpu.dot_dimension_numbers<[1], [0], [0], [1], [0, 0, 1, 1], [], []>} : vector<16x128xbf16>, vector<128x256xbf16>, vector<16x256xf32> -> vector<16x256xf32>
    %c0_15 = arith.constant 0 : index
    %c0_16 = arith.constant 0 : index
    %20 = vector.load %arg7[%c0_15, %c0_16] : memref<1x256xf32, #tpu.memory_space<vmem>>, vector<1x256xf32>
    %21 = vector.broadcast %20 : vector<1x256xf32> to vector<16x256xf32>
    %22 = arith.addf %19, %21 : vector<16x256xf32>
    %cst_17 = arith.constant 0.000000e+00 : f32
    %23 = vector.broadcast %cst_17 : f32 to vector<16x256xf32>
    %24 = arith.subf %23, %22 : vector<16x256xf32>
    %25 = math.exp %24 : vector<16x256xf32>
    %cst_18 = arith.constant 1.000000e+00 : f32
    %26 = vector.broadcast %cst_18 : f32 to vector<16x256xf32>
    %27 = arith.addf %26, %25 : vector<16x256xf32>
    %28 = tpu.reciprocal %27 {approx = true} : vector<16x256xf32> -> vector<16x256xf32>
    %c0_19 = arith.constant 0 : index
    %c0_20 = arith.constant 0 : index
    %29 = vector.load %arg8[%c0_19, %c0_20] : memref<16x256xf32, #tpu.memory_space<vmem>>, vector<16x256xf32>
    tpu.vector_store %arg8[%c0_19, %c0_20], %28 {strides = array<i32>} : memref<16x256xf32, #tpu.memory_space<vmem>>, vector<16x256xf32>,
    return
  }
  func.func @transform_0(%arg0: i32) -> (i32, i32) {
    %c0_i32 = arith.constant 0 : i32
    %c0_i32_0 = arith.constant 0 : i32
    return %arg0, %c0_i32 : i32, i32
  }
  func.func @transform_1(%arg0: i32) -> (i32, i32) {
    %c0_i32 = arith.constant 0 : i32
    %c0_i32_0 = arith.constant 0 : i32
    %c0_i32_1 = arith.constant 0 : i32
    return %c0_i32, %c0_i32_0 : i32, i32
  }
  func.func @transform_2(%arg0: i32) -> (i32, i32) {
    %c0_i32 = arith.constant 0 : i32
    %c0_i32_0 = arith.constant 0 : i32
    %c0_i32_1 = arith.constant 0 : i32
    return %c0_i32, %c0_i32_0 : i32, i32
  }
  func.func @transform_3(%arg0: i32) -> (i32, i32) {
    %c0_i32 = arith.constant 0 : i32
    %c0_i32_0 = arith.constant 0 : i32
    %c0_i32_1 = arith.constant 0 : i32
    return %c0_i32, %c0_i32_0 : i32, i32
  }
  func.func @transform_4(%arg0: i32) -> (i32, i32) {
    %c0_i32 = arith.constant 0 : i32
    %c0_i32_0 = arith.constant 0 : i32
    %c0_i32_1 = arith.constant 0 : i32
    return %c0_i32, %c0_i32_0 : i32, i32
  }
  func.func @transform_5(%arg0: i32) -> (i32, i32) {
    %c0_i32 = arith.constant 0 : i32
    %c0_i32_0 = arith.constant 0 : i32
    %c0_i32_1 = arith.constant 0 : i32
    return %c0_i32, %c0_i32_0 : i32, i32
  }
  func.func @transform_6(%arg0: i32) -> (i32, i32) {
    %c0_i32 = arith.constant 0 : i32
    %c0_i32_0 = arith.constant 0 : i32
    %c0_i32_1 = arith.constant 0 : i32
    return %c0_i32, %c0_i32_0 : i32, i32
  }
  func.func @transform_7(%arg0: i32) -> (i32, i32) {
    %c0_i32 = arith.constant 0 : i32
    %c0_i32_0 = arith.constant 0 : i32
    return %arg0, %c0_i32 : i32, i32
  }
}

</mosaic_0001>

<bundles_post_ra>
// kernel: decoder_forward.1
= control target key start
LH: loop header
LB: loop body
LE: loop exit
PB: predicated region body
PF: predicated region fallthrough
CT: control target
= control target key end

     0   :  { %12 = vsyncpa [#allocation3], 0  ;;  %s791_s0 = inlined_call_operand.hbm [shape: f32[16,32], index: 0, kind: input, shape index: {}]   ;;  %s792_s1 = inlined_call_operand.hbm [shape: bf16[32,128], index: 1, kind: input, shape index: {}]   ;;  %s793_s2 = inlined_call_operand.vmem [shape: f32[1,128], index: 2, kind: input, shape index: {}]   ;;  %s794_s3 = inlined_call_operand.hbm [shape: bf16[128,128], index: 3, kind: input, shape index: {}]   ;;  %s795_s4 = inlined_call_operand.vmem [shape: f32[1,128], index: 4, kind: input, shape index: {}]   ;;  %s796_s5 = inlined_call_operand.hbm [shape: bf16[128,256], index: 5, kind: input, shape index: {}]   ;;  %s797_s6 = inlined_call_operand.vmem [shape: f32[1,256], index: 6, kind: input, shape index: {}]   ;;  %s798_s7 = inlined_call_operand.hbm [shape: f32[16,256], index: 7, kind: output, shape index: {}]  }
   0x1   :  { %13 = vsyncpa [#allocation6], 0 }
   0x2   :  { %14 = vsyncpa [#allocation9], 0 }
   0x3   :  { %15 = vsyncpa [#allocation4], 0  ;;  %s707_s24 = smov [#allocation5]  }
   0x4   :  { %s33_s25 = sshll.u32 %s707_s24, 4  ;;  %s34_s25 = int_to_ptr.vmem [resolvable:$true] %s33_s25 }
   0x5   :  { %s607_s26 = scalar_lea.vmem %s34_s25, 256  ;;  %p612_p1 = scmp.lt.s32.totalorder %s34_s25, %s34_s25 }
   0x6   :  { %p608_p0 = scmp.ne.s32.totalorder %s34_s25, %s607_s26  ;;  %p613_p2 = scmp.lt.s32.totalorder %s607_s26, %s607_s26 }
   0x8   :  { %p614_p3 = por %p613_p2, %p612_p1 }
   0xa   :  { %p615_p4 = pnand %p614_p3, %p608_p0 }
   0xc   :  { %618 = shalt.err (!%p615_p4)
}
   0xd   :  { %s708_s27 = smov 64   ;;  %s709_s28 = smov 4  }
   0xe   :  { %39 = dma.hbm_to_vmem [thread:$0]  %s792_s1, 256, %s34_s25, [#allocation6], %s708_s27, %s708_s27, %s709_s28  }
   0xf   :  { %s710_s8 = smov [#allocation2]  }
  0x10   :  { %s21_s9 = sshll.u32 %s710_s8, 4  ;;  %s22_s9 = int_to_ptr.vmem [resolvable:$true] %s21_s9 }
  0x11   :  { %s627_s10 = scalar_lea.vmem %s22_s9, 256  ;;  %p632_p6 = scmp.lt.s32.totalorder %s22_s9, %s22_s9 }
  0x12   :  { %p628_p5 = scmp.ne.s32.totalorder %s22_s9, %s627_s10  ;;  %p633_p7 = scmp.lt.s32.totalorder %s627_s10, %s627_s10 }
  0x14   :  { %p634_p8 = por %p633_p7, %p632_p6 }
  0x16   :  { %p635_p9 = pnand %p634_p8, %p628_p5 }
  0x18   :  { %638 = shalt.err (!%p635_p9)
}
  0x19   :  { %s711_s11 = smov 128   ;;  %s712_s12 = smov 8  }
  0x1a   :  { %27 = dma.hbm_to_vmem [thread:$0]  %s791_s0, 256, %s22_s9, [#allocation3], %s711_s11, %s711_s11, %s712_s12  }
  0x1b   :  { %s713_s15 = smov [#allocation7]   ;;  %s714_s17 = smov [#allocation8]  }
  0x1c   :  { %s47_s16 = sshll.u32 %s713_s15, 4  ;;  %s61_s1 = sshll.u32 %s714_s17, 4  ;;  %s48_s16 = int_to_ptr.vmem [resolvable:$true] %s47_s16  ;;  %s62_s1 = int_to_ptr.vmem [resolvable:$true] %s61_s1 }
  0x1d   :  { %s647_s18 = scalar_lea.vmem %s48_s16, 1024  ;;  %p652_p11 = scmp.lt.s32.totalorder %s48_s16, %s48_s16 }
  0x1e   :  { %p648_p10 = scmp.ne.s32.totalorder %s48_s16, %s647_s18  ;;  %p653_p12 = scmp.lt.s32.totalorder %s647_s18, %s647_s18 }
  0x20   :  { %p654_p13 = por %p653_p12, %p652_p11 }
  0x22   :  { %p655_p0 = pnand %p654_p13, %p648_p10 }
  0x24   :  { %658 = shalt.err (!%p655_p0)
}
  0x25   :  { %53 = dma.hbm_to_vmem [thread:$0]  %s794_s3, 1024, %s48_s16, [#allocation6], %s708_s27, %s708_s27, %s709_s28  }
  0x26   :  { %s667_s0 = scalar_lea.vmem %s62_s1, 2048  ;;  %p672_p2 = scmp.lt.s32.totalorder %s62_s1, %s62_s1 }
  0x27   :  { %p668_p1 = scmp.ne.s32.totalorder %s62_s1, %s667_s0  ;;  %p673_p3 = scmp.lt.s32.totalorder %s667_s0, %s667_s0 }
  0x29   :  { %p674_p4 = por %p673_p3, %p672_p2 }
  0x2b   :  { %p675_p5 = pnand %p674_p4, %p668_p1 }
  0x2d   :  { %678 = shalt.err (!%p675_p5)
}
  0x2e   :  { %67 = dma.hbm_to_vmem [thread:$0]  %s796_s5, 2048, %s62_s1, [#allocation9], %s711_s11, %s711_s11, %s712_s12  }
  0x2f   :  { %699 = dma.done.wait [#allocation3], 256  }
  0x30   :  { %700 = vsyncadd [#allocation3], 4294967040 }
  0x31   :  { %701 = dma.done.wait [#allocation6], 1280  }
  0x32   :  { %702 = vsyncadd [#allocation6], 4294966016 }
  0x33   :  { %703 = dma.done.wait [#allocation9], 2048  }
  0x34   :  { %704 = vsyncadd [#allocation9], 4294965248  ;;  %v715_v0 = vmov 0.0   ;;  %vm716_vm0 = vmmov 0   ;;  %v549_v1 = vld [vmem:[#allocation5 + $0x8] sm:$0xff]   ;;  %v550_v2 = vld [vmem:[#allocation5] sm:$0xff]   ;;  %v290_v51 = vlaneseq }
  0x35   :  { %507 = vmatprep.subr.bf16.mxu0 %v715_v0  ;;  %511 = vmatprep.mubr.msk.bf16.mxu0 %vm716_vm0, %v715_v0  ;;  %v83_v3 = vld [vmem:[#allocation2] sm:$0xff]  ;;  %v84_v4 = vld [vmem:[#allocation2 + $0x8] sm:$0xff]  ;;  %v551_v5 = vld [vmem:[#allocation7 + $0x38] sm:$0xff]   ;;  %vm109_vm1 = vcmask 261120   ;;  %v717_v40 = vmov 0  }
  0x36   :  { %515 = vmatprep.subr.bf16.mxu1 %v715_v0  ;;  %531 = vmatprep.mubr.msk.bf16.mxu1 %vm716_vm0, %v715_v0  ;;  %v85_v6 = vpack.c.bf16 %v84_v4, %v83_v3  ;;  %v552_v7 = vld [vmem:[#allocation7 + $0x30] sm:$0xff]   ;;  %v553_v8 = vld [vmem:[#allocation7 + $0x28] sm:$0xff]   ;;  %v554_v9 = vld [vmem:[#allocation7 + $0x20] sm:$0xff]   ;;  %v291_v52 = vshrl.u32 %v290_v51, 7 }
  0x37   :  { %508 = vmatpush3.bf16.msra.mxu0 %v549_v1  ;;  %516 = vmatpush3.bf16.msra.mxu1 %v551_v5  ;;  %v555_v10 = vld [vmem:[#allocation7 + $0x18] sm:$0xff]   ;;  %v556_v11 = vld [vmem:[#allocation7 + $0x10] sm:$0xff]   ;;  %v557_v12 = vld [vmem:[#allocation7 + $0x8] sm:$0xff]  }
  0x38   :  { %509 = vmatprep.subr.bf16.mxu0 %v715_v0  ;;  %517 = vmatprep.subr.bf16.mxu1 %v715_v0  ;;  %v558_v13 = vld [vmem:[#allocation7] sm:$0xff]   ;;  %v559_v14 = vld [vmem:[#allocation8 + $0x70] ss:$8 sps:$4 sm:$0xff]   ;;  %v561_v15 = vld [vmem:[#allocation8 + $0x74] ss:$8 sps:$4 sm:$0xff]   ;;  %v292_v53 = vsub.s32 0, %v291_v52 }
  0x39   :  { %v564_v16 = vld [vmem:[#allocation8 + $0x64] ss:$8 sps:$4 sm:$0xff]   ;;  %v562_v17 = vld [vmem:[#allocation8 + $0x60] ss:$8 sps:$4 sm:$0xff]   ;;  %v567_v18 = vld [vmem:[#allocation8 + $0x54] ss:$8 sps:$4 sm:$0xff]  }
  0x3a   :  { %v565_v19 = vld [vmem:[#allocation8 + $0x50] ss:$8 sps:$4 sm:$0xff]   ;;  %v570_v20 = vld [vmem:[#allocation8 + $0x44] ss:$8 sps:$4 sm:$0xff]   ;;  %v568_v21 = vld [vmem:[#allocation8 + $0x40] ss:$8 sps:$4 sm:$0xff]  }
  0x3b   :  { %510 = vmatpush3.bf16.msra.mxu0 %v550_v2  ;;  %518 = vmatpush3.bf16.msra.mxu1 %v552_v7  ;;  %v573_v22 = vld [vmem:[#allocation8 + $0x34] ss:$8 sps:$4 sm:$0xff]   ;;  %v571_v23 = vld [vmem:[#allocation8 + $0x30] ss:$8 sps:$4 sm:$0xff]   ;;  %v576_v24 = vld [vmem:[#allocation8 + $0x24] ss:$8 sps:$4 sm:$0xff]  }
  0x3c   :  { %519 = vmatprep.subr.bf16.mxu1 %v715_v0  ;;  %380 = vmatprep.subr.bf16.mxu0 %v561_v15  ;;  %v574_v25 = vld [vmem:[#allocation8 + $0x20] ss:$8 sps:$4 sm:$0xff]   ;;  %v579_v36 = vld [vmem:[#allocation8 + $0x14] ss:$8 sps:$4 sm:$0xff]   ;;  %v577_v37 = vld [vmem:[#allocation8 + $0x10] ss:$8 sps:$4 sm:$0xff]  }
  0x3d   :  { %v466_v26 = vld [vmem:[%s793_s2] ss:$0 sm:$0xff]  ;;  %v582_v38 = vld [vmem:[#allocation8 + $0x4] ss:$8 sps:$4 sm:$0xff]   ;;  %v296_v55 = vsub.s32 1, %v291_v52 }
  0x3e   :  { %512 = vmatmul.mubr.msk.bf16.vlgmr.msra.gmra.mxu0 %vm109_vm1, %v85_v6  ;;  %v580_v39 = vld [vmem:[#allocation8] ss:$8 sps:$4 sm:$0xff]  }
  0x3f   :  { %520 = vmatpush3.bf16.msra.mxu1 %v553_v8  ;;  %381 = vmatpush1.bf16.msra.mxu0 %v559_v14  ;;  %v470_v41 = vld [vmem:[%s795_s4] ss:$0 sm:$0xff]  ;;  %s718_s4 = smov [#allocation10]  }
  0x40   :  { %521 = vmatprep.subr.bf16.mxu1 %v715_v0  ;;  %382 = vmatprep.subr.bf16.mxu0 %v564_v16  ;;  %v288_v54 = vld [vmem:[%s797_s6] sm:$0x3]  ;;  %s452_s6 = sshll.u32 %s718_s4, 4  ;;  %s453_s6 = int_to_ptr.vmem [resolvable:$true] %s452_s6 }
  0x41   :  { %412 = vmatprep.mubr.bf16.mxu0 %v717_v40  ;;  %v293_v56 = vrot.slane %v288_v54, %v292_v53  ;;  %v297_v57 = vrot.slane %v288_v54, %v296_v55  ;;  %s679_s26 = scalar_lea.vmem %s453_s6, 512  ;;  %p684_p7 = scmp.lt.s32.totalorder %s453_s6, %s453_s6 }
  0x42   :  { %p680_p6 = scmp.ne.s32.totalorder %s453_s6, %s679_s26  ;;  %p685_p8 = scmp.lt.s32.totalorder %s679_s26, %s679_s26 }
  0x43   :  { %522 = vmatpush3.bf16.msra.mxu1 %v554_v9  ;;  %383 = vmatpush1.bf16.msra.mxu0 %v562_v17 }
  0x44   :  { %523 = vmatprep.subr.bf16.mxu1 %v715_v0  ;;  %384 = vmatprep.subr.bf16.mxu0 %v567_v18  ;;  %p686_p9 = por %p685_p8, %p684_p7 }
  0x46   :  { %p687_p10 = pnand %p686_p9, %p680_p6 }
  0x47   :  { %524 = vmatpush3.bf16.msra.mxu1 %v555_v10  ;;  %385 = vmatpush1.bf16.msra.mxu0 %v565_v19 }
  0x48   :  { %525 = vmatprep.subr.bf16.mxu1 %v715_v0  ;;  %386 = vmatprep.subr.bf16.mxu0 %v570_v20 }
  0x4b   :  { %526 = vmatpush3.bf16.msra.mxu1 %v556_v11  ;;  %387 = vmatpush1.bf16.msra.mxu0 %v568_v21 }
  0x4c   :  { %527 = vmatprep.subr.bf16.mxu1 %v715_v0  ;;  %388 = vmatprep.subr.bf16.mxu0 %v573_v22 }
  0x4f   :  { %528 = vmatpush3.bf16.msra.mxu1 %v557_v12  ;;  %389 = vmatpush1.bf16.msra.mxu0 %v571_v23 }
  0x50   :  { %529 = vmatprep.subr.bf16.mxu1 %v715_v0  ;;  %390 = vmatprep.subr.bf16.mxu0 %v576_v24 }
  0x53   :  { %530 = vmatpush3.bf16.msra.mxu1 %v558_v13  ;;  %391 = vmatpush1.bf16.msra.mxu0 %v574_v25 }
  0x54   :  { %392 = vmatprep.subr.bf16.mxu0 %v579_v36 }
  0x57   :  { %393 = vmatpush1.bf16.msra.mxu0 %v577_v37 }
  0x58   :  { %394 = vmatprep.subr.bf16.mxu0 %v582_v38 }
  0x5b   :  { %395 = vmatpush1.bf16.msra.mxu0 %v580_v39 }
  0xfe   :  { %v147_v27 = vpop.f32.mrf.mxu0 }
  0xff   :  { %v148_v29 = vadd.f32 %v466_v26, %v147_v27 }
 0x100   :  { %v513_v28 = vpop.f32.mrf.mxu0 }
 0x101   :  { %v154_v33 = vmax.f32 %v148_v29, 0.0 }
 0x102   :  { %v150_v30 = vpop.f32.mrf.mxu0 }
 0x103   :  { %v151_v31 = vadd.f32 %v466_v26, %v150_v30 }
 0x104   :  { %v514_v32 = vpop.f32.mrf.mxu0 }
 0x105   :  { %v155_v34 = vmax.f32 %v151_v31, 0.0 }
 0x107   :  { %v156_v35 = vpack.c.bf16 %v155_v34, %v154_v33 }
 0x109   :  { %532 = vmatmul.mubr.bf16.vlgmr.msra.gmra.mxu1 %v156_v35 }
 0x1c9   :  { %v262_v42 = vpop.f32.mrf.mxu1 }
 0x1ca   :  { %v263_v44 = vadd.f32 %v470_v41, %v262_v42 }
 0x1cb   :  { %v533_v43 = vpop.f32.mrf.mxu1 }
 0x1cc   :  { %v269_v48 = vmax.f32 %v263_v44, 0.0 }
 0x1cd   :  { %v265_v45 = vpop.f32.mrf.mxu1 }
 0x1ce   :  { %v266_v46 = vadd.f32 %v470_v41, %v265_v45 }
 0x1cf   :  { %v534_v47 = vpop.f32.mrf.mxu1 }
 0x1d0   :  { %v270_v49 = vmax.f32 %v266_v46, 0.0 }
 0x1d2   :  { %v271_v50 = vpack.c.bf16 %v270_v49, %v269_v48 }
 0x1d4   :  { %413 = vmatmul.mubr.bf16.vlgmr.msra.gmra.mxu0 %v271_v50 }
 0x294   :  { %v414_v58 = vpop.f32.mrf.mxu0 }
 0x295   :  { %v415_v59 = vadd.f32 %v414_v58, %v293_v56 }
 0x296   :  { %v416_v60 = vpop.f32.mrf.mxu0 }
 0x297   :  { %v423_v61 = vsub.f32 0.0, %v415_v59  ;;  %v417_v62 = vadd.f32 %v416_v60, %v297_v57 }
 0x298   :  { %v418_v63 = vpop.f32.mrf.mxu0 }
 0x299   :  { %v427_v0 = vmul.f32 1.442695, %v423_v61  ;;  %v424_v1 = vsub.f32 0.0, %v417_v62  ;;  %v419_v2 = vadd.f32 %v418_v63, %v293_v56 }
 0x29a   :  { %v420_v3 = vpop.f32.mrf.mxu0 }
 0x29b   :  { %583 = vpow2.f32 %v427_v0  ;;  %v429_v4 = vmul.f32 1.442695, %v424_v1  ;;  %v425_v5 = vsub.f32 0.0, %v419_v2  ;;  %v421_v6 = vadd.f32 %v420_v3, %v297_v57 }
 0x29d   :  { %585 = vpow2.f32 %v429_v4  ;;  %v431_v7 = vmul.f32 1.442695, %v425_v5  ;;  %v426_v8 = vsub.f32 0.0, %v421_v6 }
 0x29f   :  { %587 = vpow2.f32 %v431_v7  ;;  %v433_v9 = vmul.f32 1.442695, %v426_v8 }
 0x2a1   :  { %589 = vpow2.f32 %v433_v9 }
 0x2a8   :  { %v584_v10 = vpop.eup %583 }
 0x2a9   :  { %v435_v11 = vadd.f32 1.0, %v584_v10 }
 0x2aa   :  { %v586_v12 = vpop.eup %585 }
 0x2ab   :  { %591 = vrcp.f32 %v435_v11  ;;  %v436_v13 = vadd.f32 1.0, %v586_v12 }
 0x2ac   :  { %v588_v14 = vpop.eup %587 }
 0x2ad   :  { %593 = vrcp.f32 %v436_v13  ;;  %v437_v15 = vadd.f32 1.0, %v588_v14 }
 0x2ae   :  { %v590_v16 = vpop.eup %589 }
 0x2af   :  { %595 = vrcp.f32 %v437_v15  ;;  %v438_v17 = vadd.f32 1.0, %v590_v16 }
 0x2b1   :  { %597 = vrcp.f32 %v438_v17 }
 0x2b8   :  { %v592_v18 = vpop.eup %591 }
 0x2b9   :  { %443 = vst [vmem:[#allocation10] sm:$0xff] %v592_v18 }
 0x2ba   :  { %v594_v19 = vpop.eup %593 }
 0x2bb   :  { %444 = vst [vmem:[#allocation10 + $0x8] sm:$0xff] %v594_v19 }
 0x2bc   :  { %v596_v20 = vpop.eup %595 }
 0x2bd   :  { %445 = vst [vmem:[#allocation10 + $0x10] sm:$0xff] %v596_v20 }
 0x2be   :  { %v598_v21 = vpop.eup %597 }
 0x2bf   :  { %446 = vst [vmem:[#allocation10 + $0x18] sm:$0xff] %v598_v21 }
 0x2c0   :  { %690 = shalt.err (!%p687_p10)
}
 0x2c1   :  { %s719_s27 = smov 256   ;;  %s720_s28 = smov 16  }
 0x2c2   :  { %458 = dma.vmem_to_hbm [thread:$0]  %s453_s6, 512, %s798_s7, [#allocation4], %s719_s27, %s719_s27, %s720_s28  }
 0x2c3   :  { %705 = dma.done.wait [#allocation4], 512  }
 0x2c4   :  { %706 = vsyncadd [#allocation4], 4294966784 }
 0x2c5   :  { %462 = vsyncpa [#allocation3], 1 }
 0x2c6   :  { %463 = vsyncpa [#allocation6], 1 }
 0x2c7   :  { %464 = vsyncpa [#allocation9], 1 }
 0x2c8   :  { %465 = vsyncpa [#allocation4], 1 }

</bundles_post_ra>
